<compile_context>
chip_gen: v7x
topology: tpu7x:2x2x1
jax: 0.10.0
libtpu: 0.0.40
codegen_flags: <defaults>
</compile_context>

<pallas_src>
import jax
import jax.numpy as jnp
import numpy as np
from jax.experimental import pallas as pl
from jax.experimental.pallas import tpu as pltpu

H1, H2 = 64, 32
_LANE = 128


def _round_up(x, m):
    return (x + m - 1) // m * m


def _mlp_kernel(x_ref, w1_ref, b1_ref, w2_ref, b2_ref, w3_ref, b3_ref, o_ref):
    """One batch tile: x (tile_b, D) f32 -> o (1, tile_b) f32 (lane-dense)."""
    # Layer 1: bf16 cast happens here (in-kernel, no extra HBM pass over x), MXU dot with
    # f32 accumulation; bias add + ReLU stay f32 on the VPU (v5e has no bf16 VPU path).
    xb = x_ref[...].astype(jnp.bfloat16)
    h1 = jnp.dot(xb, w1_ref[...], preferred_element_type=jnp.float32)
    h1 = jnp.maximum(h1 + b1_ref[...], 0.0)
    # Layer 2: plain f32 matmul (K=64 -> MXU throughput nowhere near binding).
    h2 = jnp.dot(h1, w2_ref[...], preferred_element_type=jnp.float32)
    h2 = jnp.maximum(h2 + b2_ref[...], 0.0)
    # Layer 3: contract the hidden dim of the (1, 32) weight row against (tile_b, 32)
    # (same contraction pattern as flash-attention q @ k^T), producing a (1, tile_b) block:
    # batch lands on the lane axis so stores are unmasked, full-lane vst.
    out = jax.lax.dot_general(
        w3_ref[...], h2,
        dimension_numbers=(((1,), (1,)), ((), ())),
        preferred_element_type=jnp.float32)
    o_ref[...] = (out + b3_ref[0, 0]).astype(o_ref.dtype)


def _pick_tile_b(batch, input_dim):
    """Pick (tile_b, vmem_limit_bytes) from the real per-row VMEM footprint.

    Footprint counts lane padding: the (tile_b, D) f32 x block occupies
    (tile_b, round_up(D,128)) in VMEM, and the f32 h1/h2 intermediates pad their 64/32
    feature lanes to 128.  Budget is generation-aware via get_tpu_info (v7x has 64 MiB
    physical VMEM per TC vs 128 MiB on v5e/v6e)."""
    d_pad = _round_up(max(input_dim, 1), _LANE)
    per_row = (2 * d_pad * 4                    # double-buffered f32 x block
               + d_pad * 2                      # in-kernel bf16 copy of the x block
               + 2 * _round_up(H1, _LANE) * 4   # h1 pre/post-ReLU f32 temporaries
               + 2 * _round_up(H2, _LANE) * 4   # h2 pre/post-ReLU f32 temporaries
               + 2 * 4)                         # double-buffered (1, tile_b) f32 output
    try:
        vmem_bytes = pltpu.get_tpu_info().vmem_capacity_bytes
    except Exception:
        vmem_bytes = 64 << 20                   # assume the smallest (v7x per-core) if unknown
    if vmem_bytes >= (100 << 20):               # v5e / v6e: 128 MiB physical VMEM
        budget, vmem_limit = 40 << 20, 64 << 20
    else:                                       # v7x: 64 MiB physical VMEM per TensorCore
        budget, vmem_limit = 20 << 20, 32 << 20

    tile = max(_LANE, (budget // per_row) // _LANE * _LANE)
    tile = min(tile, 32768)                     # keep per-step latency / pipeline depth sane
    if batch > _LANE:
        # Keep at least 2 (roughly even) grid steps so "parallel" can use both v7x TCs.
        tile = min(tile, max(_LANE, _round_up(-(-batch // 2), _LANE)))
    tile = min(tile, _round_up(batch, _LANE))   # never tile past the batch
    return tile, vmem_limit


def stress_predictor_forward(x, params, *, tile_b=None):
    """x: (B, input_dim) float32 -> (B, 1) float32."""
    w1, b1, w2, b2, w3, b3 = params
    B, D = x.shape

    auto_tile, vmem_limit = _pick_tile_b(B, D)
    if tile_b is None:
        tile_b = auto_tile
    assert tile_b % _LANE == 0, tile_b
    n_tiles = pl.cdiv(B, tile_b)
    B_pad = n_tiles * tile_b                    # output sized to whole tiles (no OOB stores)

    # Only the tiny layer-1 weight is cast to bf16 (so layer 1 hits the bf16 MXU path once the
    # x block is cast in-kernel); everything else stays f32.  No copy of x is made.
    w1b = w1.astype(jnp.bfloat16)
    w3r = w3.reshape(1, H2)                     # (32, 1) -> (1, 32) row for the q@k^T-style dot

    flops = 2 * B_pad * (D * H1 + H1 * H2 + H2)
    bytes_accessed = (x.size * 4 + w1b.size * 2 + (w2.size + w3r.size) * 4
                      + (b1.size + b2.size + b3.size) * 4 + B_pad * 4)

    out = pl.pallas_call(
        _mlp_kernel,
        out_shape=jax.ShapeDtypeStruct((1, B_pad), jnp.float32),
        grid=(n_tiles,),
        in_specs=[
            pl.BlockSpec((tile_b, D), lambda i: (i, 0)),   # x: f32, streamed tile-by-tile
            pl.BlockSpec((D, H1), lambda i: (0, 0)),       # weights / biases: VMEM-resident
            pl.BlockSpec((1, H1), lambda i: (0, 0)),
            pl.BlockSpec((H1, H2), lambda i: (0, 0)),
            pl.BlockSpec((1, H2), lambda i: (0, 0)),
            pl.BlockSpec((1, H2), lambda i: (0, 0)),
            pl.BlockSpec(memory_space=pltpu.MemorySpace.SMEM),  # b3: true scalar in SMEM
        ],
        out_specs=pl.BlockSpec((1, tile_b), lambda i: (0, i)),  # lane-dense output blocks
        compiler_params=pltpu.CompilerParams(
            dimension_semantics=("parallel",),     # shards grid steps across v7x's 2 TCs
            vmem_limit_bytes=vmem_limit,
        ),
        cost_estimate=pl.CostEstimate(
            flops=flops, transcendentals=0, bytes_accessed=bytes_accessed),
    )(x, w1b, b1, w2, b2, w3r, b3)

    # (1, B_pad) lane-dense result -> (B, 1); padded lanes (garbage rows) are dropped here.
    return out[0, :B].reshape(B, 1)


def init_params(key, input_dim):
    """Deterministic init mirroring nn.Linear default (uniform(-1/sqrt(fan_in), 1/sqrt(fan_in)))."""
    def linear_init(k, fan_in, fan_out):
        kw, kb = jax.random.split(k)
        bound = 1.0 / np.sqrt(fan_in)
        w = jax.random.uniform(kw, (fan_in, fan_out), jnp.float32, -bound, bound)
        b = jax.random.uniform(kb, (1, fan_out), jnp.float32, -bound, bound)
        return w, b

    k1, k2, k3 = jax.random.split(key, 3)
    w1, b1 = linear_init(k1, input_dim, H1)
    w2, b2 = linear_init(k2, H1, H2)
    w3, b3 = linear_init(k3, H2, 1)
    return (w1, b1, w2, b2, w3, b3)


def reference_forward(x, params):
    w1, b1, w2, b2, w3, b3 = params
    h = jnp.maximum(x @ w1 + b1, 0.0)
    h = jnp.maximum(h @ w2 + b2, 0.0)
    return h @ w3 + b3


if __name__ == "__main__":
    key = jax.random.PRNGKey(0)
    k_params, k_x = jax.random.split(key)

    batch, input_dim = 300, 16          # batch not a multiple of the tile -> exercises raggedness
    params = init_params(k_params, input_dim)
    x = jax.random.normal(k_x, (batch, input_dim), jnp.float32)

    out = stress_predictor_forward(x, params)   # auto tile: >=2 grid steps, weights resident
    out = jax.block_until_ready(out)

    ref = reference_forward(x, params)
    assert out.shape == (batch, 1), out.shape
    # Layer 1 runs bf16 x bf16 (f32 accumulate) vs. the pure-f32 reference -> loose tolerance.
    np.testing.assert_allclose(np.asarray(out), np.asarray(ref), rtol=2e-2, atol=2e-2)

    print("KERNEL_OK")
</pallas_src>

<mosaic_0001>
module attributes {stable_mosaic.version = 11 : i64} {
  func.func @_mlp_kernel(%arg0: i32, %arg1: memref<256x16xf32, #tpu.memory_space<vmem>>, %arg2: memref<16x64xbf16, #tpu.memory_space<vmem>>, %arg3: memref<1x64xf32, #tpu.memory_space<vmem>>, %arg4: memref<64x32xf32, #tpu.memory_space<vmem>>, %arg5: memref<1x32xf32, #tpu.memory_space<vmem>>, %arg6: memref<1x32xf32, #tpu.memory_space<vmem>>, %arg7: memref<1x1xf32, #tpu.memory_space<smem>>, %arg8: memref<1x256xf32, #tpu.memory_space<vmem>>) attributes {dimension_semantics = [#tpu.dimension_semantics<parallel>], iteration_bounds = array<i64: 2>, scalar_prefetch = 0 : i64, scratch_operands = 0 : i64, tpu.core_type = #tpu.core_type<tc>, window_params = [{transform_indices = @transform_0, window_bounds = array<i64: 256, 16>}, {pipeline_mode = #tpu.pipeline_mode<synchronous>, transform_indices = @transform_1, window_bounds = array<i64: 16, 64>}, {pipeline_mode = #tpu.pipeline_mode<synchronous>, transform_indices = @transform_2, window_bounds = array<i64: 1, 64>}, {pipeline_mode = #tpu.pipeline_mode<synchronous>, transform_indices = @transform_3, window_bounds = array<i64: 64, 32>}, {pipeline_mode = #tpu.pipeline_mode<synchronous>, transform_indices = @transform_4, window_bounds = array<i64: 1, 32>}, {pipeline_mode = #tpu.pipeline_mode<synchronous>, transform_indices = @transform_5, window_bounds = array<i64: 1, 32>}, {transform_indices = @transform_6, window_bounds = array<i64: 1, 1>}, {transform_indices = @transform_7, window_bounds = array<i64: 1, 256>}]} {
    %c0 = arith.constant 0 : index
    %c0_0 = arith.constant 0 : index
    %0 = vector.load %arg1[%c0, %c0_0] : memref<256x16xf32, #tpu.memory_space<vmem>>, vector<256x16xf32>
    %1 = arith.truncf %0 : vector<256x16xf32> to vector<256x16xbf16>
    %c0_1 = arith.constant 0 : index
    %c0_2 = arith.constant 0 : index
    %2 = vector.load %arg2[%c0_1, %c0_2] : memref<16x64xbf16, #tpu.memory_space<vmem>>, vector<16x64xbf16>
    %cst = arith.constant dense<0.000000e+00> : vector<256x64xf32>
    %3 = tpu.matmul %1, %2, %cst {dimension_numbers = #tpu.dot_dimension_numbers<[1], [0], [0], [1], [0, 0, 1, 1], [], []>} : vector<256x16xbf16>, vector<16x64xbf16>, vector<256x64xf32> -> vector<256x64xf32>
    %c0_3 = arith.constant 0 : index
    %c0_4 = arith.constant 0 : index
    %4 = vector.load %arg3[%c0_3, %c0_4] : memref<1x64xf32, #tpu.memory_space<vmem>>, vector<1x64xf32>
    %5 = vector.broadcast %4 : vector<1x64xf32> to vector<256x64xf32>
    %6 = arith.addf %3, %5 : vector<256x64xf32>
    %cst_5 = arith.constant 0.000000e+00 : f32
    %7 = vector.broadcast %cst_5 : f32 to vector<256x64xf32>
    %8 = arith.maximumf %6, %7 : vector<256x64xf32>
    %c0_6 = arith.constant 0 : index
    %c0_7 = arith.constant 0 : index
    %9 = vector.load %arg4[%c0_6, %c0_7] : memref<64x32xf32, #tpu.memory_space<vmem>>, vector<64x32xf32>
    %cst_8 = arith.constant dense<0.000000e+00> : vector<256x32xf32>
    %10 = tpu.matmul %8, %9, %cst_8 {dimension_numbers = #tpu.dot_dimension_numbers<[1], [0], [0], [1], [0, 0, 1, 1], [], []>} : vector<256x64xf32>, vector<64x32xf32>, vector<256x32xf32> -> vector<256x32xf32>
    %c0_9 = arith.constant 0 : index
    %c0_10 = arith.constant 0 : index
    %11 = vector.load %arg5[%c0_9, %c0_10] : memref<1x32xf32, #tpu.memory_space<vmem>>, vector<1x32xf32>
    %12 = vector.broadcast %11 : vector<1x32xf32> to vector<256x32xf32>
    %13 = arith.addf %10, %12 : vector<256x32xf32>
    %cst_11 = arith.constant 0.000000e+00 : f32
    %14 = vector.broadcast %cst_11 : f32 to vector<256x32xf32>
    %15 = arith.maximumf %13, %14 : vector<256x32xf32>
    %c0_12 = arith.constant 0 : index
    %c0_13 = arith.constant 0 : index
    %16 = vector.load %arg6[%c0_12, %c0_13] : memref<1x32xf32, #tpu.memory_space<vmem>>, vector<1x32xf32>
    %cst_14 = arith.constant dense<0.000000e+00> : vector<1x256xf32>
    %17 = tpu.matmul %16, %15, %cst_14 {dimension_numbers = #tpu.dot_dimension_numbers<[1], [1], [0], [0], [0, 0, 1, 0], [], []>} : vector<1x32xf32>, vector<256x32xf32>, vector<1x256xf32> -> vector<1x256xf32>
    %c0_15 = arith.constant 0 : index
    %c0_16 = arith.constant 0 : index
    %18 = memref.load %arg7[%c0_15, %c0_16] : memref<1x1xf32, #tpu.memory_space<smem>>
    %19 = vector.broadcast %18 : f32 to vector<1x256xf32>
    %20 = arith.addf %17, %19 : vector<1x256xf32>
    %c0_17 = arith.constant 0 : index
    %c0_18 = arith.constant 0 : index
    %21 = vector.load %arg8[%c0_17, %c0_18] : memref<1x256xf32, #tpu.memory_space<vmem>>, vector<1x256xf32>
    tpu.vector_store %arg8[%c0_17, %c0_18], %20 {strides = array<i32>} : memref<1x256xf32, #tpu.memory_space<vmem>>, vector<1x256xf32>,
    return
  }
  func.func @transform_0(%arg0: i32) -> (i32, i32) {
    %c0_i32 = arith.constant 0 : i32
    %c0_i32_0 = arith.constant 0 : i32
    return %arg0, %c0_i32 : i32, i32
  }
  func.func @transform_1(%arg0: i32) -> (i32, i32) {
    %c0_i32 = arith.constant 0 : i32
    %c0_i32_0 = arith.constant 0 : i32
    %c0_i32_1 = arith.constant 0 : i32
    return %c0_i32, %c0_i32_0 : i32, i32
  }
  func.func @transform_2(%arg0: i32) -> (i32, i32) {
    %c0_i32 = arith.constant 0 : i32
    %c0_i32_0 = arith.constant 0 : i32
    %c0_i32_1 = arith.constant 0 : i32
    return %c0_i32, %c0_i32_0 : i32, i32
  }
  func.func @transform_3(%arg0: i32) -> (i32, i32) {
    %c0_i32 = arith.constant 0 : i32
    %c0_i32_0 = arith.constant 0 : i32
    %c0_i32_1 = arith.constant 0 : i32
    return %c0_i32, %c0_i32_0 : i32, i32
  }
  func.func @transform_4(%arg0: i32) -> (i32, i32) {
    %c0_i32 = arith.constant 0 : i32
    %c0_i32_0 = arith.constant 0 : i32
    %c0_i32_1 = arith.constant 0 : i32
    return %c0_i32, %c0_i32_0 : i32, i32
  }
  func.func @transform_5(%arg0: i32) -> (i32, i32) {
    %c0_i32 = arith.constant 0 : i32
    %c0_i32_0 = arith.constant 0 : i32
    %c0_i32_1 = arith.constant 0 : i32
    return %c0_i32, %c0_i32_0 : i32, i32
  }
  func.func @transform_6(%arg0: i32) -> (i32, i32) {
    %c0_i32 = arith.constant 0 : i32
    %c0_i32_0 = arith.constant 0 : i32
    %c0_i32_1 = arith.constant 0 : i32
    return %c0_i32, %c0_i32_0 : i32, i32
  }
  func.func @transform_7(%arg0: i32) -> (i32, i32) {
    %c0_i32 = arith.constant 0 : i32
    %c0_i32_0 = arith.constant 0 : i32
    return %c0_i32, %arg0 : i32, i32
  }
}

</mosaic_0001>

<bundles_post_ra>
// kernel: tpu_custom_call.1
= control target key start
LH: loop header
LB: loop body
LE: loop exit
PB: predicated region body
PF: predicated region fallthrough
CT: control target
= control target key end

     0   :  { %s2100_s0 = inlined_call_operand.vmem [shape: f32[300,16], index: 0, kind: input, shape index: {}]   ;;  %s2101_s1 = inlined_call_operand.vmem [shape: bf16[16,64], index: 1, kind: input, shape index: {}]   ;;  %s2102_s2 = inlined_call_operand.vmem [shape: f32[1,64], index: 2, kind: input, shape index: {}]   ;;  %s2103_s3 = inlined_call_operand.vmem [shape: f32[64,32], index: 3, kind: input, shape index: {}]   ;;  %s2104_s4 = inlined_call_operand.vmem [shape: f32[1,32], index: 4, kind: input, shape index: {}]   ;;  %s2105_s5 = inlined_call_operand.vmem [shape: f32[1,32], index: 5, kind: input, shape index: {}]   ;;  %s2106_s6 = inlined_call_operand.<no memory space> [shape: f32[1,1], index: 6, kind: input, shape index: {}]   ;;  %s2107_s7 = inlined_call_operand.hbm [shape: f32[1,512], index: 7, kind: output, shape index: {}]  }
   0x1   :  { %12 = sst [smem:[#allocation2]] %s2106_s6 }
   0x2   :  { %13 = vsyncpa [#allocation4], 0 }
   0x3   :  { %15 = vsyncpa [#allocation4 + $0x1], 0  ;;  %s1747_s26 = smov 0   ;;  %s1749_s27 = smov 0  }
   0x4   :  { %s1751_s28 = smov 0   ;;  %s1753_s29 = smov 0  }
   0x5 LB: > { %s1246_s6 = sadd.s32 4294967295, %s1700_s29   ;;  %s1247_s30 = sadd.s32 4294967294, %s1700_s29   ;;  %s1700_s29 = sphi %s1753_s29, %s2115_s29   ;;  %s1696_s28 = sphi %s1751_s28, %s2114_s28   ;;  %s1692_s27 = sphi %s1749_s27, %s2113_s27   ;;  %s1688_s26 = sphi %s1747_s26, %s2112_s26  }
   0x6   : > { %s1770_s8 = sadd.s32 1, %s1700_s29   ;;  %s180_s9 = sadd.s32 1, %s1696_s28 }
   0x7   : > { %s177_s10 = ssub.s32 %s1700_s29, %s1770_s8  ;;  %p190_p0 = scmp.ne.s32.totalorder %s1696_s28, %s1692_s27 }
   0x8   : > { %p178_p1 = scmp.eq.s32.totalorder %s177_s10, 0  ;;  %p191_p2 = scmp.eq.s32.totalorder %s1246_s6, 1 }
   0x9   : > { %p196_p3 = scmp.ne.s32.totalorder %s1692_s27, %s1688_s26  ;;  %p197_p4 = scmp.eq.s32.totalorder %s1247_s30, 1 }
   0xa   : > { %s1780_s11 = scalar_select %p178_p1, %s1696_s28, %s180_s9  }
   0xb   : > { %p1782_p5 = por %p191_p2, %p190_p0  ;;  %p1786_p6 = por %p197_p4, %p196_p3 }
   0xc   : > { %p1250_p7 = scmp.ge.s32.totalorder %s1700_s29, 1  ;;  %p250_p8 = scmp.lt.s32.totalorder %s1700_s29, 3 }
   0xe   : > { %p251_p9 = pnand %p1250_p7, %p250_p8 }
   0xf   : > { %v1637_v0 = vld [vmem:[%s2101_s1] sm:$0xff] (!%p251_p9)   ;;  %s1795_s16 = sshll.u32 (!%p251_p9), %s1246_s6, 5  ;;  %v608_v2 = vld [vmem:[%s2103_s3 + $0x8] sm:$0xff] (!%p251_p9)  ;;  %v609_v3 = vld [vmem:[%s2103_s3 + $0x10] sm:$0xff] (!%p251_p9)  ;;  %vm365_vm0 = vcmask (!%p251_p9), 130048   ;;  %vm622_vm1 = vcmask (!%p251_p9), 523264  }
  0x10   : > { %254 = sbr.rel (%p251_p9) target bundleno = 800 (0x320), region = 48  ;;  %p291_p10 = scmp.lt.s32.totalorder (!%p251_p9), %s1795_s16, 37  ;;  %v607_v1 = vld [vmem:[%s2103_s3] sm:$0xff] (!%p251_p9)  ;;  %1435 = vmatprep.subr.bf16.mxu0 (!%p251_p9), %v1637_v0  ;;  %v610_v5 = vld [vmem:[%s2103_s3 + $0x18] sm:$0xff] (!%p251_p9)  ;;  %v612_v56 = vld [vmem:[%s2103_s3 + $0x28] sm:$0xff] (!%p251_p9)  ;;  %vm979_vm2 = vcmask (!%p251_p9), 261120  }
  0x11   : > { %v1533_v4 = vpack.c.bf16 (!%p251_p9), %v608_v2, %v607_v1  ;;  %1436 = vmatpush3.bf16.msra.mxu0 (!%p251_p9), %v1637_v0  ;;  %v1537_v6 = vpack.c.bf16 (!%p251_p9), %v610_v5, %v609_v3  ;;  %v611_v55 = vld [vmem:[%s2103_s3 + $0x20] sm:$0xff] (!%p251_p9)  ;;  %v613_v58 = vld [vmem:[%s2103_s3 + $0x30] sm:$0xff] (!%p251_p9)  ;;  %v614_v59 = vld [vmem:[%s2103_s3 + $0x38] sm:$0xff] (!%p251_p9)  ;;  %s283_s14 = sand.u32 (!%p251_p9), 1, %s1692_s27   ;;  %s2058_s21 = scalar_lea.hbm (!%p251_p9), %s2107_s7, %s1795_s16 }
  0x12   : > { %v1541_v57 = vpack.c.bf16 (!%p251_p9), %v612_v56, %v611_v55  ;;  %v1545_v60 = vpack.c.bf16 (!%p251_p9), %v614_v59, %v613_v58  ;;  %v1879_v61 = vld [vmem:[%s2102_s2] ss:$0 sm:$0xff] (!%p251_p9)  ;;  %vm1994_vm3 = vmpackc.low (!%p251_p9), %vm979_vm2, %vm979_vm2  ;;  %s1251_s15 = sshll.u32 (!%p251_p9), %s283_s14, 1  ;;  %s1174_s22 = scalar_lea.sflag (!%p251_p9), [#allocation4], %s283_s14 }
  0x13   : > { %1534 = vmatprep.subr.bf16.mxu1 (!%p251_p9), %v1533_v4  ;;  %s285_s17 = scalar_lea.vmem (!%p251_p9), [#allocation3], %s1251_s15  ;;  %s1703_s24 = smov (!%p251_p9), [#allocation3]  }
  0x14   : > { %1536 = vmatpush3.bf16.msra.mxu1 (!%p251_p9), %v1533_v4  ;;  %s1188_s18 = sshll.u32 (!%p251_p9), %s285_s17, 4  ;;  %s2060_s18 = int_to_ptr.vmem [resolvable:$true] %s1188_s18 }
  0x15   : > { %1538 = vmatprep.subr.bf16.mxu1 (!%p251_p9), %v1537_v6  ;;  %s1638_s23 = scalar_lea.vmem (!%p251_p9), %s2060_s18, 32 }
  0x16   : > { %p1639_p11 = scmp.ne.s32.totalorder (!%p251_p9), %s2060_s18, %s1638_s23 }
  0x17   : > { %s292_s25 = scalar_select %p291_p10, %s1795_s16, 37 }
  0x18   : > { %1540 = vmatpush3.bf16.msra.mxu1 %v1537_v6  ;;  %p1640_p12 = pnand %p1639_p11, %p1782_p5 }
  0x19   : > { %s1253_s6 = sshll.u32 %s292_s25, 3  ;;  %1542 = vmatprep.subr.bf16.mxu1 %v1541_v57  ;;  %s1642_s25 = sshll.u32 %s1703_s24, 4  ;;  %s1643_s25 = int_to_ptr.vmem [resolvable:$false] %s1642_s25 }
  0x1a   : > { %s1814_s10 = scalar_lea.vmem %s2100_s0, %s1253_s6  ;;  %p1641_p13 = pneg %p1640_p12 }
  0x1b   : > { %v302_v7 = vld [vmem:[%s1814_s10] sm:$0xff]  ;;  %v303_v8 = vld [vmem:[%s1814_s10 + $0x8] sm:$0xff]  ;;  %v304_v9 = vld [vmem:[%s1814_s10 + $0x10] sm:$0xff]  ;;  %s1644_s6 = scalar_lea.vmem %s1643_s25, 64  ;;  %p1645_p0 = scmp.lt.s32.totalorder %s2060_s18, %s1643_s25 }
  0x1c   : > { %v334_v10 = vpack.c.bf16 %v303_v8, %v302_v7  ;;  %v305_v11 = vld [vmem:[%s1814_s10 + $0x18] sm:$0xff]  ;;  %v306_v12 = vld [vmem:[%s1814_s10 + $0x20] sm:$0xff]  ;;  %v307_v13 = vld [vmem:[%s1814_s10 + $0x28] sm:$0xff]  ;;  %1544 = vmatpush3.bf16.msra.mxu1 %v1541_v57  ;;  %p1646_p1 = scmp.lt.s32.totalorder %s1644_s6, %s1638_s23 }
  0x1d   : > { %v335_v14 = vpack.c.bf16 %v305_v11, %v304_v9  ;;  %v336_v15 = vpack.c.bf16 %v307_v13, %v306_v12  ;;  %v308_v16 = vld [vmem:[%s1814_s10 + $0x30] sm:$0xff]  ;;  %v309_v17 = vld [vmem:[%s1814_s10 + $0x38] sm:$0xff]  ;;  %v310_v18 = vld [vmem:[%s1814_s10 + $0x40] sm:$0xff]  ;;  %1546 = vmatprep.subr.bf16.mxu1 %v1545_v60 }
  0x1e   : > { %1437 = vmatprep.mubr.msk.bf16.mxu0 %vm365_vm0, %v334_v10  ;;  %v311_v19 = vld [vmem:[%s1814_s10 + $0x48] sm:$0xff]  ;;  %v337_v20 = vpack.c.bf16 %v309_v17, %v308_v16  ;;  %v312_v22 = vld [vmem:[%s1814_s10 + $0x50] sm:$0xff]  ;;  %v313_v23 = vld [vmem:[%s1814_s10 + $0x58] sm:$0xff]  ;;  %p1647_p2 = por %p1646_p1, %p1645_p0 }
  0x1f   : > { %1438 = vmatmul.mubr.msk.bf16.vlgmr.msra.gmra.mrb[0].mxu0 %vm365_vm0, %v335_v14  ;;  %v338_v21 = vpack.c.bf16 %v311_v19, %v310_v18  ;;  %v314_v24 = vld [vmem:[%s1814_s10 + $0x60] sm:$0xff]  ;;  %v315_v25 = vld [vmem:[%s1814_s10 + $0x68] sm:$0xff]  ;;  %v339_v26 = vpack.c.bf16 %v313_v23, %v312_v22  ;;  %v316_v28 = vld [vmem:[%s1814_s10 + $0x70] sm:$0xff] }
  0x20   : > { %1441 = vmatprep.mubr.msk.bf16.mxu0 %vm365_vm0, %v336_v15  ;;  %v340_v27 = vpack.c.bf16 %v315_v25, %v314_v24  ;;  %v317_v29 = vld [vmem:[%s1814_s10 + $0x78] sm:$0xff]  ;;  %v318_v30 = vld [vmem:[%s1814_s10 + $0x80] sm:$0xff]  ;;  %v319_v31 = vld [vmem:[%s1814_s10 + $0x88] sm:$0xff]  ;;  %1548 = vmatpush3.bf16.msra.mxu1 %v1545_v60  ;;  %p1648_p3 = pnand %p1647_p2, %p1641_p13 }
  0x21   : > { %v341_v32 = vpack.c.bf16 %v317_v29, %v316_v28  ;;  %v342_v33 = vpack.c.bf16 %v319_v31, %v318_v30  ;;  %v320_v34 = vld [vmem:[%s1814_s10 + $0x90] sm:$0xff]  ;;  %v321_v35 = vld [vmem:[%s1814_s10 + $0x98] sm:$0xff]  ;;  %v322_v36 = vld [vmem:[%s1814_s10 + $0xa0] sm:$0xff] }
  0x22   : > { %v323_v37 = vld [vmem:[%s1814_s10 + $0xa8] sm:$0xff]  ;;  %v343_v38 = vpack.c.bf16 %v321_v35, %v320_v34  ;;  %v324_v40 = vld [vmem:[%s1814_s10 + $0xb0] sm:$0xff]  ;;  %v325_v41 = vld [vmem:[%s1814_s10 + $0xb8] sm:$0xff] }
  0x23   : > { %v344_v39 = vpack.c.bf16 %v323_v37, %v322_v36  ;;  %v326_v42 = vld [vmem:[%s1814_s10 + $0xc0] sm:$0xff]  ;;  %v327_v43 = vld [vmem:[%s1814_s10 + $0xc8] sm:$0xff]  ;;  %v345_v44 = vpack.c.bf16 %v325_v41, %v324_v40  ;;  %v328_v46 = vld [vmem:[%s1814_s10 + $0xd0] sm:$0xff] }
  0x24   : > { %v346_v45 = vpack.c.bf16 %v327_v43, %v326_v42  ;;  %v329_v47 = vld [vmem:[%s1814_s10 + $0xd8] sm:$0xff]  ;;  %v330_v48 = vld [vmem:[%s1814_s10 + $0xe0] sm:$0xff]  ;;  %v331_v49 = vld [vmem:[%s1814_s10 + $0xe8] sm:$0xff] }
  0x25   : > { %v347_v50 = vpack.c.bf16 %v329_v47, %v328_v46  ;;  %v348_v51 = vpack.c.bf16 %v331_v49, %v330_v48  ;;  %v332_v52 = vld [vmem:[%s1814_s10 + $0xf0] sm:$0xff]  ;;  %v333_v53 = vld [vmem:[%s1814_s10 + $0xf8] sm:$0xff]  ;;  %s977_s10 = sld [smem:[#allocation2]] }
  0x26   : > { %v349_v54 = vpack.c.bf16 %v333_v53, %v332_v52 }
  0x27   : > { %1442 = vmatmul.mubr.msk.bf16.gmra.mrb[4].mxu0 %vm365_vm0, %v337_v20 }
  0x28   : > { %1445 = vmatprep.mubr.msk.bf16.mxu0 %vm365_vm0, %v338_v21 }
  0x2f   : > { %1446 = vmatmul.mubr.msk.bf16.gmra.mrb[8].mxu0 %vm365_vm0, %v339_v26 }
  0x30   : > { %1449 = vmatprep.mubr.msk.bf16.mxu0 %vm365_vm0, %v340_v27 }
  0x37   : > { %1450 = vmatmul.mubr.msk.bf16.gmra.mrb[12].mxu0 %vm365_vm0, %v341_v32 }
  0x38   : > { %1453 = vmatprep.mubr.msk.bf16.mxu0 %vm365_vm0, %v342_v33 }
  0x3f   : > { %1454 = vmatmul.mubr.msk.bf16.gmra.mrb[16].mxu0 %vm365_vm0, %v343_v38 }
  0x40   : > { %1457 = vmatprep.mubr.msk.bf16.mxu0 %vm365_vm0, %v344_v39 }
  0x47   : > { %1458 = vmatmul.mubr.msk.bf16.gmra.mrb[20].mxu0 %vm365_vm0, %v345_v44 }
  0x48   : > { %1461 = vmatprep.mubr.msk.bf16.mxu0 %vm365_vm0, %v346_v45 }
  0x4f   : > { %1462 = vmatmul.mubr.msk.bf16.gmra.mrb[24].mxu0 %vm365_vm0, %v347_v50 }
  0x50   : > { %1465 = vmatprep.mubr.msk.bf16.mxu0 %vm365_vm0, %v348_v51 }
  0x57   : > { %1466 = vmatmul.mubr.msk.bf16.gmra.mrb[28].mxu0 %vm365_vm0, %v349_v54 }
  0xf2   : > { %v1439_v62 = vpop.f32.mrb[0].mxu0 }
  0xf3   : > { %v448_v63 = vpop.f32.mrb[1].mxu0  ;;  %v457_v2 = vadd.f32 %v1439_v62, %v1879_v61 }
  0xf4   : > { %v449_v0 = vadd.f32 %v1879_v61, %v448_v63  ;;  %v1440_v1 = vpop.f32.mrb[2].mxu0 }
  0xf5   : > { %v451_v3 = vpop.f32.mrb[3].mxu0  ;;  %v460_v6 = vadd.f32 %v1440_v1, %v1879_v61  ;;  %v577_v8 = vmax.f32 %v457_v2, 0.0 }
  0xf6   : > { %v575_v4 = vmax.f32 %v449_v0, 0.0  ;;  %v452_v5 = vadd.f32 %v1879_v61, %v451_v3 }
  0xf7   : > { %v578_v11 = vmax.f32 %v460_v6, 0.0 }
  0xf8   : > { %v576_v7 = vmax.f32 %v452_v5, 0.0  ;;  %1485 = vmatprep.mubr.msk.f32.mxu1 %vm622_vm1, %v575_v4 }
  0xfa   : > { %v1443_v9 = vpop.f32.mrb[4].mxu0  ;;  %1486 = vmatmul.mubr.msk.f32.vlgmr.msra.gmra.mrb[0].mxu1 %vm622_vm1, %v576_v7 }
  0xfb   : > { %v464_v10 = vpop.f32.mrb[5].mxu0  ;;  %1488 = vmatprep.mubr.msk.f32.mxu1 %vm622_vm1, %v577_v8  ;;  %v473_v14 = vadd.f32 %v1443_v9, %v1879_v61 }
  0xfc   : > { %v465_v12 = vadd.f32 %v1879_v61, %v464_v10  ;;  %v1444_v13 = vpop.f32.mrb[6].mxu0 }
  0xfd   : > { %v467_v15 = vpop.f32.mrb[7].mxu0  ;;  %v476_v18 = vadd.f32 %v1444_v13, %v1879_v61  ;;  %v581_v20 = vmax.f32 %v473_v14, 0.0 }
  0xfe   : > { %v579_v16 = vmax.f32 %v465_v12, 0.0  ;;  %v468_v17 = vadd.f32 %v1879_v61, %v467_v15  ;;  %1489 = vmatmul.mubr.msk.f32.gmra.mrb[2].mxu1 %vm622_vm1, %v578_v11 }
  0xff   : > { %v582_v23 = vmax.f32 %v476_v18, 0.0 }
 0x100   : > { %v580_v19 = vmax.f32 %v468_v17, 0.0  ;;  %1491 = vmatprep.mubr.msk.f32.mxu1 %vm622_vm1, %v579_v16 }
 0x102   : > { %v1447_v21 = vpop.f32.mrb[8].mxu0  ;;  %1492 = vmatmul.mubr.msk.f32.gmra.mrb[4].mxu1 %vm622_vm1, %v580_v19 }
 0x103   : > { %v480_v22 = vpop.f32.mrb[9].mxu0  ;;  %1494 = vmatprep.mubr.msk.f32.mxu1 %vm622_vm1, %v581_v20  ;;  %v489_v26 = vadd.f32 %v1447_v21, %v1879_v61 }
 0x104   : > { %v481_v24 = vadd.f32 %v1879_v61, %v480_v22  ;;  %v1448_v25 = vpop.f32.mrb[10].mxu0 }
 0x105   : > { %v483_v27 = vpop.f32.mrb[11].mxu0  ;;  %v492_v30 = vadd.f32 %v1448_v25, %v1879_v61  ;;  %v585_v32 = vmax.f32 %v489_v26, 0.0 }
 0x106   : > { %v583_v28 = vmax.f32 %v481_v24, 0.0  ;;  %v484_v29 = vadd.f32 %v1879_v61, %v483_v27  ;;  %1495 = vmatmul.mubr.msk.f32.gmra.mrb[6].mxu1 %vm622_vm1, %v582_v23 }
 0x107   : > { %v586_v35 = vmax.f32 %v492_v30, 0.0 }
 0x108   : > { %v584_v31 = vmax.f32 %v484_v29, 0.0  ;;  %1497 = vmatprep.mubr.msk.f32.mxu1 %vm622_vm1, %v583_v28 }
 0x10a   : > { %v1451_v33 = vpop.f32.mrb[12].mxu0  ;;  %1498 = vmatmul.mubr.msk.f32.gmra.mrb[8].mxu1 %vm622_vm1, %v584_v31  ;;  %v1948_v31 = vld [vmem:[%s2105_s5] sm:$0x1] }
 0x10b   : > { %v496_v34 = vpop.f32.mrb[13].mxu0  ;;  %1500 = vmatprep.mubr.msk.f32.mxu1 %vm622_vm1, %v585_v32  ;;  %v505_v38 = vadd.f32 %v1451_v33, %v1879_v61  ;;  %1433 = vmatprep.mubr.msk.f32.mxu0 %vm979_vm2, %v1948_v31 }
 0x10c   : > { %v497_v36 = vadd.f32 %v1879_v61, %v496_v34  ;;  %v1452_v37 = vpop.f32.mrb[14].mxu0 }
 0x10d   : > { %v499_v39 = vpop.f32.mrb[15].mxu0  ;;  %v508_v42 = vadd.f32 %v1452_v37, %v1879_v61  ;;  %v589_v44 = vmax.f32 %v505_v38, 0.0 }
 0x10e   : > { %v587_v40 = vmax.f32 %v497_v36, 0.0  ;;  %v500_v41 = vadd.f32 %v1879_v61, %v499_v39  ;;  %1501 = vmatmul.mubr.msk.f32.gmra.mrb[10].mxu1 %vm622_vm1, %v586_v35 }
 0x10f   : > { %v590_v47 = vmax.f32 %v508_v42, 0.0 }
 0x110   : > { %v588_v43 = vmax.f32 %v500_v41, 0.0  ;;  %1503 = vmatprep.mubr.msk.f32.mxu1 %vm622_vm1, %v587_v40 }
 0x112   : > { %v1455_v45 = vpop.f32.mrb[16].mxu0  ;;  %1504 = vmatmul.mubr.msk.f32.gmra.mrb[12].mxu1 %vm622_vm1, %v588_v43 }
 0x113   : > { %v512_v46 = vpop.f32.mrb[17].mxu0  ;;  %1506 = vmatprep.mubr.msk.f32.mxu1 %vm622_vm1, %v589_v44  ;;  %v521_v50 = vadd.f32 %v1455_v45, %v1879_v61 }
 0x114   : > { %v513_v48 = vadd.f32 %v1879_v61, %v512_v46  ;;  %v1456_v49 = vpop.f32.mrb[18].mxu0 }
 0x115   : > { %v515_v51 = vpop.f32.mrb[19].mxu0  ;;  %v524_v54 = vadd.f32 %v1456_v49, %v1879_v61  ;;  %v593_v56 = vmax.f32 %v521_v50, 0.0 }
 0x116   : > { %v591_v52 = vmax.f32 %v513_v48, 0.0  ;;  %v516_v53 = vadd.f32 %v1879_v61, %v515_v51  ;;  %1507 = vmatmul.mubr.msk.f32.gmra.mrb[14].mxu1 %vm622_vm1, %v590_v47 }
 0x117   : > { %v594_v60 = vmax.f32 %v524_v54, 0.0 }
 0x118   : > { %v592_v55 = vmax.f32 %v516_v53, 0.0  ;;  %1509 = vmatprep.mubr.msk.f32.mxu1 %vm622_vm1, %v591_v52 }
 0x11a   : > { %v1459_v57 = vpop.f32.mrb[20].mxu0  ;;  %1510 = vmatmul.mubr.msk.f32.gmra.mrb[16].mxu1 %vm622_vm1, %v592_v55 }
 0x11b   : > { %v537_v58 = vadd.f32 %v1459_v57, %v1879_v61  ;;  %v528_v59 = vpop.f32.mrb[21].mxu0  ;;  %1512 = vmatprep.mubr.msk.f32.mxu1 %vm622_vm1, %v593_v56 }
 0x11c   : > { %v529_v62 = vadd.f32 %v1879_v61, %v528_v59  ;;  %v1460_v63 = vpop.f32.mrb[22].mxu0 }
 0x11d   : > { %v531_v0 = vpop.f32.mrb[23].mxu0  ;;  %v540_v2 = vadd.f32 %v1460_v63, %v1879_v61  ;;  %v597_v4 = vmax.f32 %v537_v58, 0.0 }
 0x11e   : > { %v595_v1 = vmax.f32 %v529_v62, 0.0  ;;  %v532_v3 = vadd.f32 %v1879_v61, %v531_v0  ;;  %1513 = vmatmul.mubr.msk.f32.gmra.mrb[18].mxu1 %vm622_vm1, %v594_v60 }
 0x11f   : > { %v598_v6 = vmax.f32 %v540_v2, 0.0 }
 0x120   : > { %v596_v5 = vmax.f32 %v532_v3, 0.0  ;;  %1515 = vmatprep.mubr.msk.f32.mxu1 %vm622_vm1, %v595_v1 }
 0x122   : > { %1516 = vmatmul.mubr.msk.f32.gmra.mrb[20].mxu1 %vm622_vm1, %v596_v5  ;;  %v1463_v7 = vpop.f32.mrb[24].mxu0 }
 0x123   : > { %1518 = vmatprep.mubr.msk.f32.mxu1 %vm622_vm1, %v597_v4  ;;  %v553_v8 = vadd.f32 %v1463_v7, %v1879_v61  ;;  %v544_v9 = vpop.f32.mrb[25].mxu0 }
 0x124   : > { %v545_v10 = vadd.f32 %v1879_v61, %v544_v9  ;;  %v1464_v11 = vpop.f32.mrb[26].mxu0 }
 0x125   : > { %v547_v12 = vpop.f32.mrb[27].mxu0  ;;  %v556_v14 = vadd.f32 %v1464_v11, %v1879_v61  ;;  %v601_v16 = vmax.f32 %v553_v8, 0.0 }
 0x126   : > { %1519 = vmatmul.mubr.msk.f32.gmra.mrb[22].mxu1 %vm622_vm1, %v598_v6  ;;  %v599_v13 = vmax.f32 %v545_v10, 0.0  ;;  %v548_v15 = vadd.f32 %v1879_v61, %v547_v12 }
 0x127   : > { %v602_v18 = vmax.f32 %v556_v14, 0.0 }
 0x128   : > { %v600_v17 = vmax.f32 %v548_v15, 0.0  ;;  %1521 = vmatprep.mubr.msk.f32.mxu1 %vm622_vm1, %v599_v13 }
 0x12a   : > { %1522 = vmatmul.mubr.msk.f32.gmra.mrb[24].mxu1 %vm622_vm1, %v600_v17  ;;  %v1467_v19 = vpop.f32.mrb[28].mxu0 }
 0x12b   : > { %1524 = vmatprep.mubr.msk.f32.mxu1 %vm622_vm1, %v601_v16  ;;  %v569_v20 = vadd.f32 %v1467_v19, %v1879_v61  ;;  %v560_v21 = vpop.f32.mrb[29].mxu0 }
 0x12c   : > { %v561_v22 = vadd.f32 %v1879_v61, %v560_v21  ;;  %v1468_v23 = vpop.f32.mrb[30].mxu0 }
 0x12d   : > { %v563_v24 = vpop.f32.mrb[31].mxu0  ;;  %v572_v26 = vadd.f32 %v1468_v23, %v1879_v61  ;;  %v605_v28 = vmax.f32 %v569_v20, 0.0 }
 0x12e   : > { %1525 = vmatmul.mubr.msk.f32.gmra.mrb[26].mxu1 %vm622_vm1, %v602_v18  ;;  %v603_v25 = vmax.f32 %v561_v22, 0.0  ;;  %v564_v27 = vadd.f32 %v1879_v61, %v563_v24  ;;  %v1955_v61 = vld [vmem:[%s2104_s4] ss:$0 sm:$0xff] }
 0x12f   : > { %v606_v30 = vmax.f32 %v572_v26, 0.0 }
 0x130   : > { %v604_v29 = vmax.f32 %v564_v27, 0.0  ;;  %1527 = vmatprep.mubr.msk.f32.mxu1 %vm622_vm1, %v603_v25 }
 0x132   : > { %1528 = vmatmul.mubr.msk.f32.gmra.mrb[28].mxu1 %vm622_vm1, %v604_v29 }
 0x133   : > { %1530 = vmatprep.mubr.msk.f32.mxu1 %vm622_vm1, %v605_v28 }
 0x136   : > { %1531 = vmatmul.mubr.msk.f32.gmra.mrb[30].mxu1 %vm622_vm1, %v606_v30 }
 0x1cd   : > { %v1487_v32 = vpop.f32.mrb[0].mxu1 }
 0x1ce   : > { %v791_v33 = vadd.f32 %v1487_v32, %v1955_v61  ;;  %v785_v34 = vpop.f32.mrb[1].mxu1 }
 0x1cf   : > { %v786_v35 = vadd.f32 %v1955_v61, %v785_v34 }
 0x1d0   : > { %v945_v36 = vmax.f32 %v791_v33, 0.0 }
 0x1d1   : > { %v944_v37 = vmax.f32 %v786_v35, 0.0  ;;  %v1490_v38 = vpop.f32.mrb[2].mxu1 }
 0x1d2   : > { %v801_v39 = vadd.f32 %v1490_v38, %v1955_v61  ;;  %v795_v40 = vpop.f32.mrb[3].mxu1 }
 0x1d3   : > { %v1960_v41 = vpack.c.bf16 %v945_v36, %v944_v37  ;;  %v796_v42 = vadd.f32 %v1955_v61, %v795_v40 }
 0x1d4   : > { %v947_v43 = vmax.f32 %v801_v39, 0.0 }
 0x1d5   : > { %v946_v44 = vmax.f32 %v796_v42, 0.0  ;;  %v1493_v45 = vpop.f32.mrb[4].mxu1 }
 0x1d6   : > { %v811_v46 = vadd.f32 %v1493_v45, %v1955_v61  ;;  %v805_v47 = vpop.f32.mrb[5].mxu1 }
 0x1d7   : > { %v1964_v48 = vpack.c.bf16 %v947_v43, %v946_v44  ;;  %v806_v49 = vadd.f32 %v1955_v61, %v805_v47 }
 0x1d8   : > { %v949_v50 = vmax.f32 %v811_v46, 0.0 }
 0x1d9   : > { %v948_v51 = vmax.f32 %v806_v49, 0.0  ;;  %v1496_v52 = vpop.f32.mrb[6].mxu1 }
 0x1da   : > { %v821_v53 = vadd.f32 %v1496_v52, %v1955_v61  ;;  %v815_v54 = vpop.f32.mrb[7].mxu1 }
 0x1db   : > { %v1968_v55 = vpack.c.bf16 %v949_v50, %v948_v51  ;;  %v816_v56 = vadd.f32 %v1955_v61, %v815_v54 }
 0x1dc   : > { %v951_v57 = vmax.f32 %v821_v53, 0.0 }
 0x1dd   : > { %v950_v58 = vmax.f32 %v816_v56, 0.0  ;;  %v1499_v59 = vpop.f32.mrb[8].mxu1 }
 0x1de   : > { %v831_v60 = vadd.f32 %v1499_v59, %v1955_v61  ;;  %v825_v62 = vpop.f32.mrb[9].mxu1 }
 0x1df   : > { %v1972_v63 = vpack.c.bf16 %v951_v57, %v950_v58  ;;  %v826_v0 = vadd.f32 %v1955_v61, %v825_v62 }
 0x1e0   : > { %v953_v1 = vmax.f32 %v831_v60, 0.0 }
 0x1e1   : > { %v952_v2 = vmax.f32 %v826_v0, 0.0  ;;  %v1502_v3 = vpop.f32.mrb[10].mxu1 }
 0x1e2   : > { %v841_v4 = vadd.f32 %v1502_v3, %v1955_v61  ;;  %v835_v5 = vpop.f32.mrb[11].mxu1 }
 0x1e3   : > { %v1976_v6 = vpack.c.bf16 %v953_v1, %v952_v2  ;;  %v836_v7 = vadd.f32 %v1955_v61, %v835_v5 }
 0x1e4   : > { %v955_v8 = vmax.f32 %v841_v4, 0.0 }
 0x1e5   : > { %v954_v9 = vmax.f32 %v836_v7, 0.0  ;;  %v1505_v10 = vpop.f32.mrb[12].mxu1 }
 0x1e6   : > { %v851_v11 = vadd.f32 %v1505_v10, %v1955_v61  ;;  %v845_v12 = vpop.f32.mrb[13].mxu1 }
 0x1e7   : > { %v1980_v13 = vpack.c.bf16 %v955_v8, %v954_v9  ;;  %v846_v14 = vadd.f32 %v1955_v61, %v845_v12 }
 0x1e8   : > { %v957_v15 = vmax.f32 %v851_v11, 0.0 }
 0x1e9   : > { %v956_v16 = vmax.f32 %v846_v14, 0.0  ;;  %v1508_v17 = vpop.f32.mrb[14].mxu1 }
 0x1ea   : > { %v861_v18 = vadd.f32 %v1508_v17, %v1955_v61  ;;  %v855_v19 = vpop.f32.mrb[15].mxu1 }
 0x1eb   : > { %v1984_v20 = vpack.c.bf16 %v957_v15, %v956_v16  ;;  %v856_v21 = vadd.f32 %v1955_v61, %v855_v19 }
 0x1ec   : > { %v959_v22 = vmax.f32 %v861_v18, 0.0 }
 0x1ed   : > { %v958_v23 = vmax.f32 %v856_v21, 0.0  ;;  %v1511_v24 = vpop.f32.mrb[16].mxu1 }
 0x1ee   : > { %v871_v25 = vadd.f32 %v1511_v24, %v1955_v61  ;;  %v865_v26 = vpop.f32.mrb[17].mxu1 }
 0x1ef   : > { %v1988_v27 = vpack.c.bf16 %v959_v22, %v958_v23  ;;  %v866_v28 = vadd.f32 %v1955_v61, %v865_v26 }
 0x1f0   : > { %v961_v29 = vmax.f32 %v871_v25, 0.0 }
 0x1f1   : > { %v960_v30 = vmax.f32 %v866_v28, 0.0  ;;  %v1514_v32 = vpop.f32.mrb[18].mxu1 }
 0x1f2   : > { %v881_v33 = vadd.f32 %v1514_v32, %v1955_v61  ;;  %v875_v34 = vpop.f32.mrb[19].mxu1 }
 0x1f3   : > { %v1549_v36 = vpack.c.bf16 %v961_v29, %v960_v30  ;;  %v876_v37 = vadd.f32 %v1955_v61, %v875_v34 }
 0x1f4   : > { %v963_v38 = vmax.f32 %v881_v33, 0.0 }
 0x1f5   : > { %v962_v39 = vmax.f32 %v876_v37, 0.0  ;;  %1551 = vmatprep.subr.msk.bf16.mxu0 %vm1994_vm3, %v1549_v36  ;;  %v1517_v40 = vpop.f32.mrb[20].mxu1 }
 0x1f6   : > { %1554 = vmatpush3.bf16.xpose.msk.msra.mxu0 %vm1994_vm3, %v1960_v41  ;;  %v891_v42 = vadd.f32 %v1517_v40, %v1955_v61  ;;  %v885_v43 = vpop.f32.mrb[21].mxu1 }
 0x1f7   : > { %v1555_v44 = vpack.c.bf16 %v963_v38, %v962_v39  ;;  %v886_v45 = vadd.f32 %v1955_v61, %v885_v43 }
 0x1f8   : > { %v965_v46 = vmax.f32 %v891_v42, 0.0 }
 0x1f9   : > { %v964_v47 = vmax.f32 %v886_v45, 0.0  ;;  %v1520_v49 = vpop.f32.mrb[22].mxu1  ;;  %1557 = vmatprep.subr.msk.bf16.mxu0 %vm1994_vm3, %v1555_v44 }
 0x1fa   : > { %v901_v50 = vadd.f32 %v1520_v49, %v1955_v61  ;;  %v895_v51 = vpop.f32.mrb[23].mxu1 }
 0x1fb   : > { %v1561_v52 = vpack.c.bf16 %v965_v46, %v964_v47  ;;  %v896_v53 = vadd.f32 %v1955_v61, %v895_v51 }
 0x1fc   : > { %v967_v54 = vmax.f32 %v901_v50, 0.0 }
 0x1fd   : > { %v966_v41 = vmax.f32 %v896_v53, 0.0  ;;  %v1523_v56 = vpop.f32.mrb[24].mxu1 }
 0x1fe   : > { %1560 = vmatpush3.bf16.xpose.msk.msra.mxu0 %vm1994_vm3, %v1964_v48  ;;  %v911_v57 = vadd.f32 %v1523_v56, %v1955_v61  ;;  %v905_v58 = vpop.f32.mrb[25].mxu1 }
 0x1ff   : > { %v1567_v59 = vpack.c.bf16 %v967_v54, %v966_v41  ;;  %1563 = vmatprep.subr.msk.bf16.mxu0 %vm1994_vm3, %v1561_v52  ;;  %v906_v60 = vadd.f32 %v1955_v61, %v905_v58 }
 0x200   : > { %v969_v62 = vmax.f32 %v911_v57, 0.0 }
 0x201   : > { %v968_v0 = vmax.f32 %v906_v60, 0.0  ;;  %v1526_v1 = vpop.f32.mrb[26].mxu1 }
 0x202   : > { %v921_v2 = vadd.f32 %v1526_v1, %v1955_v61  ;;  %v915_v3 = vpop.f32.mrb[27].mxu1 }
 0x203   : > { %v1573_v4 = vpack.c.bf16 %v969_v62, %v968_v0  ;;  %v916_v5 = vadd.f32 %v1955_v61, %v915_v3 }
 0x204   : > { %v971_v7 = vmax.f32 %v921_v2, 0.0 }
 0x205   : > { %v970_v48 = vmax.f32 %v916_v5, 0.0  ;;  %v1529_v8 = vpop.f32.mrb[28].mxu1 }
 0x206   : > { %1566 = vmatpush3.bf16.xpose.msk.msra.mxu0 %vm1994_vm3, %v1968_v55  ;;  %v931_v9 = vadd.f32 %v1529_v8, %v1955_v61  ;;  %v925_v10 = vpop.f32.mrb[29].mxu1 }
 0x207   : > { %1569 = vmatprep.subr.msk.bf16.mxu0 %vm1994_vm3, %v1567_v59  ;;  %v1579_v11 = vpack.c.bf16 %v971_v7, %v970_v48  ;;  %v926_v12 = vadd.f32 %v1955_v61, %v925_v10 }
 0x208   : > { %v973_v14 = vmax.f32 %v931_v9, 0.0 }
 0x209   : > { %v972_v15 = vmax.f32 %v926_v12, 0.0  ;;  %v1532_v16 = vpop.f32.mrb[30].mxu1 }
 0x20a   : > { %v941_v17 = vadd.f32 %v1532_v16, %v1955_v61  ;;  %v935_v18 = vpop.f32.mrb[31].mxu1 }
 0x20b   : > { %v1585_v19 = vpack.c.bf16 %v973_v14, %v972_v15  ;;  %v936_v21 = vadd.f32 %v1955_v61, %v935_v18  ;;  %v1702_v61 = vmov 1966171168  }
 0x20c   : > { %v975_v22 = vmax.f32 %v941_v17, 0.0 }
 0x20d   : > { %v974_v55 = vmax.f32 %v936_v21, 0.0 }
 0x20e   : > { %1572 = vmatpush3.bf16.xpose.msk.msra.mxu0 %vm1994_vm3, %v1972_v63  ;;  %v1154_v63 = vunpack.c.l.s4 %v1702_v61 }
 0x20f   : > { %1575 = vmatprep.subr.msk.bf16.mxu0 %vm1994_vm3, %v1573_v4  ;;  %v1591_v23 = vpack.c.bf16 %v975_v22, %v974_v55 }
 0x210   : > { %v1155_v24 = vunpack.c.0.s8 %v1154_v63 }
 0x216   : > { %1578 = vmatpush3.bf16.xpose.msk.msra.mxu0 %vm1994_vm3, %v1976_v6  ;;  %v1156_v6 = vlaneseq }
 0x217   : > { %1581 = vmatprep.subr.msk.bf16.mxu0 %vm1994_vm3, %v1579_v11 }
 0x218   : > { %v1157_v25 = vshrl.u32 %v1156_v6, 7  ;;  %vm1170_vm4 = vcmp.lt.s32.totalorder %v1156_v6, 256 }
 0x21a   : > { %v1158_v30 = vsub.s32 %v1155_v24, %v1157_v25 }
 0x21e   : > { %1584 = vmatpush3.bf16.xpose.msk.msra.mxu0 %vm1994_vm3, %v1980_v13  ;;  %v978_v13 = vstv %s977_s10 }
 0x21f   : > { %1587 = vmatprep.subr.msk.bf16.mxu0 %vm1994_vm3, %v1585_v19 }
 0x226   : > { %1590 = vmatpush3.bf16.xpose.msk.msra.mxu0 %vm1994_vm3, %v1984_v20 }
 0x227   : > { %1593 = vmatprep.subr.msk.bf16.mxu0 %vm1994_vm3, %v1591_v23 }
 0x22e   : > { %1596 = vmatpush3.bf16.xpose.msk.msra.mxu0 %vm1994_vm3, %v1988_v27 }
 0x235   : > { %1434 = vmatmul.mubr.msk.f32.vlgmr.msra.gmra.mrb[32].mxu0 %vm979_vm2, %v1948_v31 }
 0x308   : > { %v1145_v20 = vpop.f32.mrb[32].mxu0 }
 0x309   : > { %v1146_v26 = vadd.f32 %v1145_v20, %v978_v13  ;;  %v1147_v28 = vpop.f32.mrb[33].mxu0 }
 0x30a   : > { %v1148_v29 = vadd.f32 %v1147_v28, %v978_v13 }
 0x30c   : > { %v1152_v27 = vcombine.low %v1146_v26, %v1148_v29 }
 0x30e   : > { %v1159_v31 = vrot.slane %v1152_v27, %v1158_v30 }
 0x310   : > { %v1166_v32 = vrot.slane %v1159_v31, %v1158_v30 }
 0x312   : > { %1172 = vst.msk [vmem:[%s285_s17] sm:$0x3] %vm1170_vm4, %v1166_v32 }
 0x313   : > { %1651 = shalt.err (!%p1648_p3)
}
 0x314   : > { %s1652_s16 = scalar_lea.hbm %s2058_s21, 32  ;;  %s1656_s10 = scalar_lea.hbm %s2107_s7, 64 }
 0x315   : > { %p1653_p4 = scmp.ne.s32.totalorder %s2058_s21, %s1652_s16  ;;  %p1657_p9 = scmp.lt.u32.totalorder %s2058_s21, %s2107_s7 }
 0x316   : > { %p1658_p10 = scmp.lt.u32.totalorder %s1656_s10, %s1652_s16  ;;  %p1660_p12 = scmp.lt.u32.totalorder %s1652_s16, %s2058_s21 }
 0x317   : > { %p1654_p7 = pnand %p1653_p4, %p1782_p5 }
 0x318   : > { %p1659_p11 = por %p1658_p10, %p1657_p9 }
 0x319   : > { %p1655_p8 = pneg %p1654_p7 }
 0x31a   : > { %p1661_p13 = por %p1660_p12, %p1659_p11 }
 0x31c   : > { %p1662_p0 = pnand %p1661_p13, %p1655_p8 }
 0x31e   : > { %1665 = shalt.err (!%p1662_p0)
}
 0x31f   : > { %1597 = dma.vmem_to_hbm [thread:$0]  (%p1782_p5), %s2060_s18, 32, %s2058_s21, %s1174_s22  }
 0x320 PF: > { %p1603_p1 = scmp.ge.s32.totalorder %s1700_s29, 2  ;;  %s1200_s17 = sand.u32 1, %s1688_s26  }
 0x321   : > { %s1201_s19 = scalar_lea.sflag [#allocation4], %s1200_s17 }
 0x322   : > { %p1600_p2 = pnand %p1603_p1, %p1786_p6 }
 0x324   : > { %1683 = dma.done.wait (!%p1600_p2), %s1201_s19, 32  }
 0x325   : > { %1685 = vsyncadd (!%p1600_p2), %s1201_s19, 4294967264  ;;  %p18_p3 = scmp.ge.s32.totalorder %s1770_s8, 4   ;;  %s2112_s26 = smov %s1692_s27 }
 0x326   : > { %s2113_s27 = smov %s1696_s28  ;;  %s2114_s28 = smov %s1780_s11 }
 0x327   : > { %s2115_s29 = smov %s1770_s8  ;;  %20 = sbr.rel (!%p18_p3) target bundleno = 5 (0x5), region = 83 }
 0x32e   :  { %1206 = vsyncpa [#allocation4], 1 }
 0x32f   :  { %1208 = vsyncpa [#allocation4 + $0x1], 1 }

</bundles_post_ra>
